<compile_context>
chip_gen: v6e
topology: v6e:2x2x1
jax: 0.10.0
libtpu: 0.0.40
codegen_flags: <defaults>
</compile_context>

<pallas_src>
import functools

import jax
import jax.numpy as jnp
from jax.experimental import pallas as pl
from jax.experimental.pallas import tpu as pltpu

_BLOCK_BUDGET = 6 << 20    # per-block VMEM budget for the mem-bound scale pass
_FUSED_LIMIT = 4 << 20     # below this total size, fuse gate + scale in one call
_VMEM_LIMIT = 28 << 20     # explicit scoped-VMEM limit (safe on v5e/v6e/v7x)


def _pick_hw_tile(hw, row_bytes, budget):
    """Largest multiple-of-128 tile dividing `hw` whose (B*C, tile) block fits
    `budget`; full extent if it already fits or hw is not 128-aligned."""
    if hw * row_bytes <= budget or hw % 128 != 0:
        return hw
    cands = [t for t in range(128, hw + 1, 128)
             if hw % t == 0 and t * row_bytes <= budget]
    return max(cands) if cands else 128


def _pick_bc_tile(bc, row_bytes, budget):
    """Largest multiple-of-8 tile dividing `bc` whose (tile, HW) block fits
    `budget`; full extent if it already fits or bc is not 8-aligned."""
    if bc * row_bytes <= budget or bc % 8 != 0:
        # TODO(synk): pathological shapes (huge HW with tiny, non-8-aligned B*C)
        # may exceed the block budget here; rely on the explicit vmem limit.
        return bc
    cands = [t for t in range(8, bc + 1, 8)
             if bc % t == 0 and t * row_bytes <= budget]
    return max(cands) if cands else 8


# ---------------- fused path (small problems): gate + scale in one call -----
def _fused_kernel(x_ref, w1_ref, w2_ref, o_ref, g_scr, *, inv_hw):
    # x_ref / o_ref: (B, C, HW) for the current D0 slice; g_scr: (B, C, 1).
    @pl.when(pl.program_id(0) == 0)
    def _gate():
        y = jnp.sum(x_ref[...].astype(jnp.float32), axis=-1) * inv_hw      # (B, C)
        h = jnp.maximum(
            jnp.dot(y, w1_ref[...], preferred_element_type=jnp.float32), 0.0)
        g = jax.nn.sigmoid(
            jnp.dot(h, w2_ref[...], preferred_element_type=jnp.float32))
        g_scr[...] = g[:, :, None].astype(g_scr.dtype)   # one-time relayout

    # per-step scale: (B, C, HW) * (B, C, 1) -> stride-0 lane splat
    o_ref[...] = x_ref[...] * g_scr[...]


# ---------------- two-pass path (large problems) -----------------------------
def _gate_kernel(x_ref, w1_ref, w2_ref, g_ref, acc_ref, *, inv_hw):
    # x_ref: (B, C, hw_tile) of x[0]; acc_ref: (B, C) f32; g_ref: (B, C).
    k = pl.program_id(0)

    @pl.when(k == 0)
    def _init():
        acc_ref[...] = jnp.zeros_like(acc_ref)

    acc_ref[...] += jnp.sum(x_ref[...].astype(jnp.float32), axis=-1)

    @pl.when(k == pl.num_programs(0) - 1)
    def _finalize():
        y = acc_ref[...] * inv_hw
        h = jnp.maximum(
            jnp.dot(y, w1_ref[...], preferred_element_type=jnp.float32), 0.0)
        g = jax.nn.sigmoid(
            jnp.dot(h, w2_ref[...], preferred_element_type=jnp.float32))
        g_ref[...] = g.astype(g_ref.dtype)


def _scale_kernel(x_ref, g_ref, o_ref):
    # x_ref/o_ref: (bc_tile, HW); g_ref: (bc_tile, 1) -> stride-0 lane splat.
    o_ref[...] = x_ref[...] * g_ref[...]


# ---------------- wrapper -----------------------------------------------------
def se_layer(x, w1, w2):
    """x: (D0, B, C, H, W); w1: (C, C//r); w2: (C//r, C)."""
    d0, b, c, h, w = x.shape
    hw = h * w
    bc = b * c
    cr = w1.shape[1]
    itemsize = jnp.dtype(x.dtype).itemsize
    total_bytes = d0 * bc * hw * itemsize
    inv_hw = 1.0 / float(hw)

    # ---------- small problems: single fused kernel -------------------------
    if total_bytes <= _FUSED_LIMIT:
        x4 = x.reshape(d0, b, c, hw)
        out = pl.pallas_call(
            functools.partial(_fused_kernel, inv_hw=inv_hw),
            out_shape=jax.ShapeDtypeStruct((d0, b, c, hw), x.dtype),
            grid=(d0,),
            in_specs=[
                pl.BlockSpec((pl.Squeezed(), b, c, hw), lambda d: (d, 0, 0, 0)),
                pl.BlockSpec((c, cr), lambda d: (0, 0)),
                pl.BlockSpec((cr, c), lambda d: (0, 0)),
            ],
            out_specs=pl.BlockSpec((pl.Squeezed(), b, c, hw),
                                   lambda d: (d, 0, 0, 0)),
            scratch_shapes=[pltpu.VMEM((b, c, 1), x.dtype)],
            compiler_params=pltpu.CompilerParams(
                # the d==0 gate feeds later steps through scratch -> sequential
                dimension_semantics=("arbitrary",),
                vmem_limit_bytes=_VMEM_LIMIT),
            cost_estimate=pl.CostEstimate(
                flops=int(d0 * bc * hw),
                transcendentals=int(bc),
                bytes_accessed=int(2 * total_bytes)),
        )(x4, w1, w2)
        return out.reshape(d0, b, c, h, w)

    # ---------- large problems: gate pass + pipelined scale pass ------------
    # pass 1: gate from x[0] (spatial reduction gridded, f32 accumulation)
    x4 = x.reshape(d0, b, c, hw)
    hw_tile = _pick_hw_tile(hw, bc * itemsize, _BLOCK_BUDGET)
    n_hw = hw // hw_tile
    g = pl.pallas_call(
        functools.partial(_gate_kernel, inv_hw=inv_hw),
        out_shape=jax.ShapeDtypeStruct((b, c), x.dtype),
        grid=(n_hw,),
        in_specs=[
            pl.BlockSpec((pl.Squeezed(), b, c, hw_tile),
                         lambda k: (0, 0, 0, k)),          # only x[0]
            pl.BlockSpec((c, cr), lambda k: (0, 0)),
            pl.BlockSpec((cr, c), lambda k: (0, 0)),
        ],
        out_specs=pl.BlockSpec((b, c), lambda k: (0, 0)),
        scratch_shapes=[pltpu.VMEM((b, c), jnp.float32)],
        compiler_params=pltpu.CompilerParams(
            dimension_semantics=("arbitrary",),
            vmem_limit_bytes=_VMEM_LIMIT),
    )(x4, w1, w2)

    # tiny one-time relayout outside the hot loop: gate as a sublane column
    g_col = g.reshape(bc, 1)

    # pass 2: elementwise scale.  Full-HW contiguous blocks, tile over B*C.
    x3 = x.reshape(d0, bc, hw)
    bc_tile = _pick_bc_tile(bc, hw * itemsize, _BLOCK_BUDGET)
    n_bc = bc // bc_tile
    out3 = pl.pallas_call(
        _scale_kernel,
        out_shape=jax.ShapeDtypeStruct((d0, bc, hw), x.dtype),
        grid=(d0, n_bc),
        in_specs=[
            pl.BlockSpec((pl.Squeezed(), bc_tile, hw), lambda d, j: (d, j, 0)),
            pl.BlockSpec((bc_tile, 1), lambda d, j: (j, 0)),
        ],
        out_specs=pl.BlockSpec((pl.Squeezed(), bc_tile, hw),
                               lambda d, j: (d, j, 0)),
        compiler_params=pltpu.CompilerParams(
            dimension_semantics=("parallel", "parallel"),
            vmem_limit_bytes=_VMEM_LIMIT),
        cost_estimate=pl.CostEstimate(
            flops=int(d0 * bc * hw),
            transcendentals=0,
            bytes_accessed=int(2 * total_bytes)),
    )(x3, g_col)
    return out3.reshape(d0, b, c, h, w)


def _reference(x, w1, w2):
    y = jnp.mean(x[0].astype(jnp.float32), axis=(-2, -1))                  # (B, C)
    h = jnp.maximum(y @ w1, 0.0)
    g = jax.nn.sigmoid(h @ w2).astype(x.dtype)                             # (B, C)
    return x * g[None, :, :, None, None]


if __name__ == "__main__":
    key = jax.random.PRNGKey(0)
    k_x1, k_x2, k_w1, k_w2 = jax.random.split(key, 4)

    # SELayer(channel=32, reduction=16) -> hidden = 2
    D0, B, C = 2, 2, 32
    REDUCTION = 16
    CR = C // REDUCTION

    # deterministic synthetic weights stored as (in, out), i.e. W^T of nn.Linear
    w1 = jax.random.normal(k_w1, (C, CR), dtype=jnp.float32) * (1.0 / jnp.sqrt(C))
    w2 = jax.random.normal(k_w2, (CR, C), dtype=jnp.float32) * (1.0 / jnp.sqrt(CR))

    # case 1: small spatial extent -> single fused kernel
    x_small = jax.random.normal(k_x1, (D0, B, C, 16, 16), dtype=jnp.float32)
    out_small = se_layer(x_small, w1, w2)
    jax.block_until_ready(out_small)
    ref_small = _reference(x_small, w1, w2)
    assert out_small.shape == x_small.shape
    assert jnp.allclose(out_small, ref_small, atol=1e-5, rtol=1e-5), float(
        jnp.max(jnp.abs(out_small - ref_small)))

    # case 2: larger spatial extent -> two-pass path (gate + pipelined scale,
    # exercises the reduction grid and the B*C tiling with full-HW blocks)
    x_big = jax.random.normal(k_x2, (D0, B, C, 192, 192), dtype=jnp.float32)
    out_big = se_layer(x_big, w1, w2)
    jax.block_until_ready(out_big)
    ref_big = _reference(x_big, w1, w2)
    assert out_big.shape == x_big.shape
    assert jnp.allclose(out_big, ref_big, atol=1e-5, rtol=1e-5), float(
        jnp.max(jnp.abs(out_big - ref_big)))

    print("KERNEL_OK")
</pallas_src>

<mosaic_0001>
module attributes {stable_mosaic.version = 11 : i64} {
  func.func @_fused_kernel(%arg0: i32, %arg1: memref<1x2x32x256xf32, #tpu.memory_space<vmem>>, %arg2: memref<32x2xf32, #tpu.memory_space<vmem>>, %arg3: memref<2x32xf32, #tpu.memory_space<vmem>>, %arg4: memref<1x2x32x256xf32, #tpu.memory_space<vmem>>, %arg5: memref<2x32x1xf32, #tpu.memory_space<vmem>>) attributes {dimension_semantics = [#tpu.dimension_semantics<arbitrary>], iteration_bounds = array<i64: 2>, scalar_prefetch = 0 : i64, scratch_operands = 1 : i64, tpu.core_type = #tpu.core_type<tc>, window_params = [{transform_indices = @transform_0, window_bounds = array<i64: 1, 2, 32, 256>}, {pipeline_mode = #tpu.pipeline_mode<synchronous>, transform_indices = @transform_1, window_bounds = array<i64: 32, 2>}, {pipeline_mode = #tpu.pipeline_mode<synchronous>, transform_indices = @transform_2, window_bounds = array<i64: 2, 32>}, {transform_indices = @transform_3, window_bounds = array<i64: 1, 2, 32, 256>}]} {
    %c0_i32 = arith.constant 0 : i32
    %0 = arith.cmpi eq, %arg0, %c0_i32 : i32
    %1 = arith.extui %0 : i1 to i32
    %c0_i32_0 = arith.constant 0 : i32
    %2 = arith.cmpi ne, %1, %c0_i32_0 : i32
    scf.if %2 {
      %c0_11 = arith.constant 0 : index
      %c0_12 = arith.constant 0 : index
      %c0_13 = arith.constant 0 : index
      %c0_14 = arith.constant 0 : index
      %11 = vector.load %arg1[%c0_11, %c0_12, %c0_13, %c0_14] : memref<1x2x32x256xf32, #tpu.memory_space<vmem>>, vector<1x2x32x256xf32>
      %12 = vector.shape_cast %11 : vector<1x2x32x256xf32> to vector<2x32x256xf32>
      %cst = arith.constant dense<0.000000e+00> : vector<2x32xf32>
      %13 = vector.multi_reduction <add>, %12, %cst [2] : vector<2x32x256xf32> to vector<2x32xf32>
      %cst_15 = arith.constant 3.906250e-03 : f32
      %14 = vector.broadcast %cst_15 : f32 to vector<2x32xf32>
      %15 = arith.mulf %13, %14 : vector<2x32xf32>
      %c0_16 = arith.constant 0 : index
      %c0_17 = arith.constant 0 : index
      %16 = vector.load %arg2[%c0_16, %c0_17] : memref<32x2xf32, #tpu.memory_space<vmem>>, vector<32x2xf32>
      %cst_18 = arith.constant dense<0.000000e+00> : vector<2x2xf32>
      %17 = tpu.matmul %15, %16, %cst_18 {dimension_numbers = #tpu.dot_dimension_numbers<[1], [0], [0], [1], [0, 0, 1, 1], [], []>} : vector<2x32xf32>, vector<32x2xf32>, vector<2x2xf32> -> vector<2x2xf32>
      %cst_19 = arith.constant 0.000000e+00 : f32
      %18 = vector.broadcast %cst_19 : f32 to vector<2x2xf32>
      %19 = arith.maximumf %17, %18 : vector<2x2xf32>
      %c0_20 = arith.constant 0 : index
      %c0_21 = arith.constant 0 : index
      %20 = vector.load %arg3[%c0_20, %c0_21] : memref<2x32xf32, #tpu.memory_space<vmem>>, vector<2x32xf32>
      %cst_22 = arith.constant dense<0.000000e+00> : vector<2x32xf32>
      %21 = tpu.matmul %19, %20, %cst_22 {dimension_numbers = #tpu.dot_dimension_numbers<[1], [0], [0], [1], [0, 0, 1, 1], [], []>} : vector<2x2xf32>, vector<2x32xf32>, vector<2x32xf32> -> vector<2x32xf32>
      %22 = arith.negf %21 : vector<2x32xf32>
      %23 = math.exp %22 : vector<2x32xf32>
      %cst_23 = arith.constant 1.000000e+00 : f32
      %24 = vector.broadcast %cst_23 : f32 to vector<2x32xf32>
      %25 = arith.addf %24, %23 : vector<2x32xf32>
      %26 = arith.divf %24, %25 : vector<2x32xf32>
      %27 = vector.shape_cast %26 : vector<2x32xf32> to vector<2x32x1xf32>
      %c0_24 = arith.constant 0 : index
      %c0_25 = arith.constant 0 : index
      %c0_26 = arith.constant 0 : index
      %28 = vector.load %arg5[%c0_24, %c0_25, %c0_26] : memref<2x32x1xf32, #tpu.memory_space<vmem>>, vector<2x32x1xf32>
      tpu.vector_store %arg5[%c0_24, %c0_25, %c0_26], %27 {strides = array<i32>} : memref<2x32x1xf32, #tpu.memory_space<vmem>>, vector<2x32x1xf32>,
    } else {
    }
    %c0 = arith.constant 0 : index
    %c0_1 = arith.constant 0 : index
    %c0_2 = arith.constant 0 : index
    %c0_3 = arith.constant 0 : index
    %3 = vector.load %arg1[%c0, %c0_1, %c0_2, %c0_3] : memref<1x2x32x256xf32, #tpu.memory_space<vmem>>, vector<1x2x32x256xf32>
    %4 = vector.shape_cast %3 : vector<1x2x32x256xf32> to vector<2x32x256xf32>
    %c0_4 = arith.constant 0 : index
    %c0_5 = arith.constant 0 : index
    %c0_6 = arith.constant 0 : index
    %5 = vector.load %arg5[%c0_4, %c0_5, %c0_6] : memref<2x32x1xf32, #tpu.memory_space<vmem>>, vector<2x32x1xf32>
    %6 = vector.broadcast %5 : vector<2x32x1xf32> to vector<2x32x256xf32>
    %7 = arith.mulf %4, %6 : vector<2x32x256xf32>
    %c0_7 = arith.constant 0 : index
    %c0_8 = arith.constant 0 : index
    %c0_9 = arith.constant 0 : index
    %c0_10 = arith.constant 0 : index
    %8 = vector.load %arg4[%c0_7, %c0_8, %c0_9, %c0_10] : memref<1x2x32x256xf32, #tpu.memory_space<vmem>>, vector<1x2x32x256xf32>
    %9 = vector.shape_cast %8 : vector<1x2x32x256xf32> to vector<2x32x256xf32>
    %10 = vector.shape_cast %7 : vector<2x32x256xf32> to vector<1x2x32x256xf32>
    tpu.vector_store %arg4[%c0_7, %c0_8, %c0_9, %c0_10], %10 {strides = array<i32>} : memref<1x2x32x256xf32, #tpu.memory_space<vmem>>, vector<1x2x32x256xf32>,
    return
  }
  func.func @transform_0(%arg0: i32) -> (i32, i32, i32, i32) {
    %c0_i32 = arith.constant 0 : i32
    %c0_i32_0 = arith.constant 0 : i32
    %c0_i32_1 = arith.constant 0 : i32
    %c0_i32_2 = arith.constant 0 : i32
    return %arg0, %c0_i32, %c0_i32_0, %c0_i32_1 : i32, i32, i32, i32
  }
  func.func @transform_1(%arg0: i32) -> (i32, i32) {
    %c0_i32 = arith.constant 0 : i32
    %c0_i32_0 = arith.constant 0 : i32
    %c0_i32_1 = arith.constant 0 : i32
    return %c0_i32, %c0_i32_0 : i32, i32
  }
  func.func @transform_2(%arg0: i32) -> (i32, i32) {
    %c0_i32 = arith.constant 0 : i32
    %c0_i32_0 = arith.constant 0 : i32
    %c0_i32_1 = arith.constant 0 : i32
    return %c0_i32, %c0_i32_0 : i32, i32
  }
  func.func @transform_3(%arg0: i32) -> (i32, i32, i32, i32) {
    %c0_i32 = arith.constant 0 : i32
    %c0_i32_0 = arith.constant 0 : i32
    %c0_i32_1 = arith.constant 0 : i32
    %c0_i32_2 = arith.constant 0 : i32
    return %arg0, %c0_i32, %c0_i32_0, %c0_i32_1 : i32, i32, i32, i32
  }
}

</mosaic_0001>

<bundles_post_ra>
// kernel: tpu_custom_call.1
= control target key start
LH: loop header
LB: loop body
LE: loop exit
PB: predicated region body
PF: predicated region fallthrough
CT: control target
= control target key end

     0   :  { %8 = vsyncpa [#allocation4], 0  ;;  %s1147_s0 = inlined_call_operand.hbm [shape: f32[2,2,32,256], index: 0, kind: input, shape index: {}]   ;;  %s1148_s1 = inlined_call_operand.vmem [shape: f32[32,2], index: 1, kind: input, shape index: {}]   ;;  %s1149_s2 = inlined_call_operand.vmem [shape: f32[2,32], index: 2, kind: input, shape index: {}]   ;;  %s1150_s3 = inlined_call_operand.hbm [shape: f32[2,2,32,256], index: 3, kind: output, shape index: {}]  }
   0x1   :  { %10 = vsyncpa [#allocation4 + $0x1], 0 }
   0x2   :  { %11 = vsyncpa [#allocation5], 0 }
   0x3   :  { %13 = vsyncpa [#allocation5 + $0x1], 0  ;;  %s916_s12 = smov 0   ;;  %s918_s13 = smov 0  }
   0x4   :  { %s920_s14 = smov 0   ;;  %s922_s15 = smov 0  }
   0x5 LB: > { %s937_s16 = sadd.s32 4294967295, %s885_s15   ;;  %s690_s17 = sadd.s32 4294967294, %s885_s15   ;;  %s885_s15 = sphi %s922_s15, %s1165_s15   ;;  %s881_s14 = sphi %s920_s14, %s1164_s14   ;;  %s877_s13 = sphi %s918_s13, %s1163_s13   ;;  %s873_s12 = sphi %s916_s12, %s1162_s12  }
   0x6   : > { %s941_s18 = sadd.s32 1, %s885_s15   ;;  %s26_s19 = sadd.s32 1, %s881_s14 }
   0x7   : > { %s23_s20 = ssub.s32 %s885_s15, %s941_s18  ;;  %p33_p0 = scmp.ne.s32.totalorder %s881_s14, %s877_s13 }
   0x8   : > { %p24_p1 = scmp.eq.s32.totalorder %s23_s20, 0  ;;  %p34_p2 = scmp.eq.s32.totalorder %s885_s15, 0 }
   0x9   : > { %p39_p3 = scmp.ne.s32.totalorder %s877_s13, %s873_s12  ;;  %p40_p4 = scmp.eq.s32.totalorder %s937_s16, 0 }
   0xa   : > { %s953_s21 = scalar_select %p24_p1, %s881_s14, %s26_s19  }
   0xb   : > { %p955_p5 = por %p34_p2, %p33_p0  ;;  %p959_p6 = por %p40_p4, %p39_p3 }
   0xc   : > { %p105_p7 = scmp.eq.s32.totalorder %s937_s16, 1  ;;  %p111_p8 = scmp.eq.s32.totalorder %s690_s17, 1 }
   0xd   : > { %s1154_s23 = scalar_select %p959_p6, 1, 0 }
   0xe   : > { %p746_p10 = scmp.lt.s32.totalorder %s885_s15, 2  ;;  %p966_p11 = por %p105_p7, %p33_p0 }
   0xf   : > { %p970_p12 = por %p111_p8, %p39_p3  ;;  %s137_s26 = sand.u32 1, %s881_s14  }
  0x10   : > { %s1155_s24 = scalar_select %p966_p11, 1, 0 }
  0x11   : > { %s1156_s25 = scalar_select %p970_p12, 1, 0 }
  0x12   : > { %s709_s27 = sshll.u32 %s885_s15, 11  ;;  %s693_s28 = sshll.u32 %s137_s26, 7 }
  0x13   : > { %s979_s4 = scalar_lea.hbm %s1147_s0, %s709_s27  ;;  %s141_s5 = scalar_lea.vmem [#allocation3], %s693_s28 }
  0x14   : > { %s148_s6 = sshll.u32 %s141_s5, 4  ;;  %p983_p13 = pnand %p746_p10, %p955_p5  ;;  %s987_s6 = int_to_ptr.vmem [resolvable:$true] %s148_s6 }
  0x15   : > { %s989_s8 = scalar_lea.sflag [#allocation4], %s137_s26  ;;  %s793_s9 = scalar_lea.hbm %s979_s4, 2048 }
  0x16   : > { %p794_p0 = scmp.ne.s32.totalorder %s979_s4, %s793_s9  ;;  %p795_p1 = pneg %p983_p13 }
  0x17   : > { %s798_s17 = scalar_lea.hbm %s1147_s0, 4096  ;;  %p799_p4 = scmp.lt.s32.totalorder %s979_s4, %s1147_s0 }
  0x18   : > { %p796_p2 = pnand %p795_p1, %p794_p0  ;;  %p800_p5 = scmp.lt.s32.totalorder %s798_s17, %s793_s9 }
  0x1a   : > { %p797_p3 = pneg %p796_p2  ;;  %p801_p7 = por %p800_p5, %p799_p4 }
  0x1c   : > { %p802_p8 = pnand %p801_p7, %p797_p3 }
  0x1e   : > { %805 = shalt.err (!%p802_p8)
}
  0x1f   : > { %s806_s22 = scalar_lea.vmem %s987_s6, 2048  ;;  %s887_s26 = smov [#allocation3]  }
  0x20   : > { %p807_p10 = scmp.ne.s32.totalorder %s987_s6, %s806_s22  ;;  %s811_s27 = sshll.u32 %s887_s26, 4  ;;  %s812_s27 = int_to_ptr.vmem [resolvable:$false] %s811_s27 }
  0x21   : > { %s813_s28 = scalar_lea.vmem %s812_s27, 4096  ;;  %p814_p2 = scmp.lt.s32.totalorder %s987_s6, %s812_s27 }
  0x22   : > { %p809_p9 = pnand %p807_p10, %p795_p1  ;;  %p815_p12 = scmp.lt.s32.totalorder %s813_s28, %s806_s22 }
  0x24   : > { %p810_p0 = pneg %p809_p9  ;;  %p816_p11 = por %p815_p12, %p814_p2 }
  0x26   : > { %p817_p6 = pnand %p816_p11, %p810_p0 }
  0x28   : > { %820 = shalt.err (!%p817_p6)
}
  0x29   : > { %s888_s29 = smov 256   ;;  %s889_s30 = smov 16  }
  0x2a   : > { %741 = dma.hbm_to_vmem [thread:$0]  (!%p983_p13), %s979_s4, 2048, %s987_s6, %s989_s8, %s888_s29, %s888_s29, %s889_s30  }
  0x2b   : > { %p696_p9 = scmp.ge.s32.totalorder %s885_s15, 1  ;;  %p156_p1 = scmp.lt.s32.totalorder %s885_s15, 3 }
  0x2d   : > { %p157_p3 = pnand %p696_p9, %p156_p1 }
  0x2e   : > { %s1013_s5 = sand.u32 (!%p157_p3), 1, %s877_s13   ;;  %p1158_p6 = scmp.ne.s32.totalorder (!%p157_p3), %s1154_s23, 0 }
  0x2f   : > { %160 = sbr.rel (%p157_p3) target bundleno = 929 (0x3a1), region = 32  ;;  %s697_s9 = sshll.u32 (!%p157_p3), %s1013_s5, 7 }
  0x30   : > { %s163_s10 = scalar_lea.sflag (!%p157_p3), [#allocation4], %s1013_s5  ;;  %s1017_s11 = scalar_lea.vmem (!%p157_p3), [#allocation3], %s697_s9 }
  0x34   : > { %864 = dma.done.wait (%p1158_p6), %s163_s10, 2048  }
  0x35   : > { %866 = vsyncadd (%p1158_p6), %s163_s10, 4294965248  ;;  %s1023_s4 = scalar_lea.vmem [#allocation6], %s697_s9  ;;  %p699_p11 = scmp.ne.s32.totalorder %s937_s16, 0 }
  0x37   : > { %192 = sbr.rel (%p699_p11) target bundleno = 774 (0x306), region = 40 }
  0x3c   : > { %v201_v0 = vld [vmem:[%s1017_s11 + $0x40] sm:$0xff]  ;;  %v202_v1 = vld [vmem:[%s1017_s11 + $0x48] sm:$0xff]  ;;  %v203_v5 = vld [vmem:[%s1017_s11 + $0x50] sm:$0xff]  ;;  %v890_v24 = vmov 0.0   ;;  %vm891_vm0 = vmmov 0   ;;  %v253_v29 = vlaneseq  ;;  %vm264_vm1 = vcmask 130112  }
  0x3d   : > { %v193_v2 = vld [vmem:[%s1017_s11] sm:$0xff]  ;;  %v221_v3 = vadd.f32 %v202_v1, %v201_v0  ;;  %v194_v4 = vld [vmem:[%s1017_s11 + $0x8] sm:$0xff]  ;;  %v204_v6 = vld [vmem:[%s1017_s11 + $0x58] sm:$0xff]  ;;  %718 = vmatprep.subr.mxu0 %v890_v24  ;;  %729 = vmatprep.subr.mxu1 %v890_v24  ;;  %vm271_vm2 = vcmask 195712   ;;  %vm278_vm3 = vcmask 261312   ;;  %vm299_vm4 = vcmask 1041409  }
  0x3e   : > { %v209_v7 = vadd.f32 %v194_v4, %v193_v2  ;;  %v195_v8 = vld [vmem:[%s1017_s11 + $0x10] sm:$0xff]  ;;  %v196_v9 = vld [vmem:[%s1017_s11 + $0x18] sm:$0xff]  ;;  %v224_v10 = vadd.f32 %v204_v6, %v203_v5  ;;  %v205_v12 = vld [vmem:[%s1017_s11 + $0x60] sm:$0xff]  ;;  %726 = vmatprep.mubr.msk.f32.mxu0 %vm891_vm0, %v890_v24  ;;  %731 = vmatprep.mubr.msk.f32.mxu1 %vm891_vm0, %v890_v24  ;;  %v254_v31 = vand.u32 127, %v253_v29  ;;  %v256_v36 = vshrl.u32 %v253_v29, 7 }
  0x3f   : > { %222 = vadd.xlane.f32.xlu1 %v221_v3  ;;  %v212_v11 = vadd.f32 %v196_v9, %v195_v8  ;;  %v206_v13 = vld [vmem:[%s1017_s11 + $0x68] sm:$0xff]  ;;  %v197_v14 = vld [vmem:[%s1017_s11 + $0x20] sm:$0xff]  ;;  %v207_v18 = vld [vmem:[%s1017_s11 + $0x70] sm:$0xff]  ;;  %vm301_vm5 = vcmask 261120   ;;  %vm380_vm6 = vcmask 1041408   ;;  %vm376_vm7 = vcmask 15360  }
  0x40   : > { %210 = vadd.xlane.f32.xlu0 %v209_v7  ;;  %v198_v15 = vld [vmem:[%s1017_s11 + $0x28] sm:$0xff]  ;;  %v227_v16 = vadd.f32 %v206_v13, %v205_v12  ;;  %v208_v19 = vld [vmem:[%s1017_s11 + $0x78] sm:$0xff]  ;;  %v199_v20 = vld [vmem:[%s1017_s11 + $0x30] sm:$0xff]  ;;  %v259_v33 = vadd.s32 4294967288, %v254_v31  ;;  %v266_v35 = vadd.s32 4294967280, %v254_v31  ;;  %v273_v40 = vadd.s32 4294967272, %v254_v31 }
  0x41   : > { %v215_v17 = vadd.f32 %v198_v15, %v197_v14  ;;  %v200_v21 = vld [vmem:[%s1017_s11 + $0x38] sm:$0xff]  ;;  %v230_v22 = vadd.f32 %v208_v19, %v207_v18  ;;  %v243_v26 = vld [vmem:[%s1148_s1 + $0x10] sm:$0xff]  ;;  %v242_v27 = vld [vmem:[%s1148_s1 + $0x8] sm:$0xff]  ;;  %v257_v44 = vsub.s32 %v254_v31, %v256_v36  ;;  %v462_v15 = vsub.s32 0, %v256_v36 }
  0x42   : > { %v218_v23 = vadd.f32 %v200_v21, %v199_v20  ;;  %v244_v25 = vld [vmem:[%s1148_s1 + $0x18] sm:$0xff]  ;;  %v241_v28 = vld [vmem:[%s1148_s1] sm:$0xff]  ;;  %v262_v38 = vsub.s32 %v259_v33, %v256_v36  ;;  %v269_v42 = vsub.s32 %v266_v35, %v256_v36  ;;  %v276_v51 = vsub.s32 %v273_v40, %v256_v36 }
  0x43   : > { %225 = vadd.xlane.f32.xlu1 %v224_v10  ;;  %719 = vmatpush3.msra.mxu0 %v244_v25  ;;  %v375_v6 = vld [vmem:[%s1149_s2] sm:$0x3]  ;;  %v481_v18 = vsub.s32 1, %v256_v36  ;;  %vm498_vm8 = vcmask 7168  }
  0x44   : > { %213 = vadd.xlane.f32.xlu0 %v212_v11  ;;  %720 = vmatprep.subr.mxu0 %v890_v24 }
  0x45   : > { %721 = vmatpush3.msra.mxu0 %v243_v26  ;;  %730 = vmatpush3.msk.msra.mxu1 %vm380_vm6, %v375_v6 }
  0x46   : > { %722 = vmatprep.subr.mxu0 %v890_v24 }
  0x47   : > { %228 = vadd.xlane.f32.xlu1 %v227_v16  ;;  %723 = vmatpush3.msra.mxu0 %v242_v27 }
  0x48   : > { %216 = vadd.xlane.f32.xlu0 %v215_v17  ;;  %724 = vmatprep.subr.mxu0 %v890_v24 }
  0x49   : > { %725 = vmatpush3.msra.mxu0 %v241_v28 }
  0x4b   : > { %231 = vadd.xlane.f32.xlu1 %v230_v22 }
  0x4c   : > { %219 = vadd.xlane.f32.xlu0 %v218_v23 }
  0xc8   : > { %v223_v30 = vpop.xlane.xlu1 %222 }
  0xc9   : > { %v211_v32 = vpop.xlane.xlu0 %210  ;;  %v237_v45 = vmul.f32 0.00390625, %v223_v30 }
  0xca   : > { %v233_v48 = vmul.f32 0.00390625, %v211_v32 }
  0xcb   : > { %v283_v55 = vrot.slane %v237_v45, %v257_v44 }
  0xcc   : > { %v226_v34 = vpop.xlane.xlu1 %225  ;;  %v258_v59 = vrot.slane %v233_v48, %v257_v44 }
  0xcd   : > { %v214_v37 = vpop.xlane.xlu0 %213  ;;  %v238_v39 = vmul.f32 0.00390625, %v226_v34 }
  0xce   : > { %v234_v41 = vmul.f32 0.00390625, %v214_v37 }
  0xcf   : > { %v287_v50 = vrot.slane %v238_v39, %v262_v38 }
  0xd0   : > { %v229_v43 = vpop.xlane.xlu1 %228  ;;  %v263_v52 = vrot.slane %v234_v41, %v262_v38 }
  0xd1   : > { %v239_v46 = vmul.f32 0.00390625, %v229_v43  ;;  %v217_v47 = vpop.xlane.xlu0 %216  ;;  %v288_v61 = vsel %vm264_vm1, %v287_v50, %v283_v55 }
  0xd2   : > { %v235_v49 = vmul.f32 0.00390625, %v217_v47  ;;  %v265_v63 = vsel %vm264_vm1, %v263_v52, %v258_v59 }
  0xd3   : > { %v292_v53 = vrot.slane %v239_v46, %v269_v42 }
  0xd4   : > { %v232_v54 = vpop.xlane.xlu1 %231  ;;  %v270_v56 = vrot.slane %v235_v49, %v269_v42 }
  0xd5   : > { %v240_v57 = vmul.f32 0.00390625, %v232_v54  ;;  %v220_v58 = vpop.xlane.xlu0 %219  ;;  %v293_v0 = vsel %vm271_vm2, %v292_v53, %v288_v61 }
  0xd6   : > { %v236_v60 = vmul.f32 0.00390625, %v220_v58  ;;  %v272_v2 = vsel %vm271_vm2, %v270_v56, %v265_v63 }
  0xd7   : > { %v297_v62 = vrot.slane %v240_v57, %v276_v51 }
  0xd8   : > { %v277_v1 = vrot.slane %v236_v60, %v276_v51 }
  0xd9   : > { %v298_v3 = vsel %vm278_vm3, %v297_v62, %v293_v0 }
  0xda   : > { %v279_v4 = vsel %vm278_vm3, %v277_v1, %v272_v2 }
  0xdb   : > { %v300_v5 = vsel %vm299_vm4, %v298_v3, %v279_v4 }
  0xdc   : > { %727 = vmatmul.mubr.msk.f32.vlgmr.msra.gmra.mxu0 %vm301_vm5, %v300_v5 }
 0x19c   : > { %v370_v7 = vpop.f32.mrf.mxu0 }
 0x19d   : > { %v374_v8 = vmax.f32 %v370_v7, 0.0 }
 0x19e   : > { %v728_v9 = vpop.f32.mrf.mxu0 }
 0x19f   : > { %732 = vmatmul.mubr.msk.f32.vlgmr.msra.gmra.mxu1 %vm376_vm7, %v374_v8 }
 0x25f   : > { %v450_v10 = vpop.f32.mrf.mxu1 }
 0x260   : > { %v703_v11 = vmul.f32 -1.442695, %v450_v10 }
 0x261   : > { %v733_v12 = vpop.f32.mrf.mxu1 }
 0x262   : > { %787 = vpow2.f32 %v703_v11 }
 0x26f   : > { %v788_v13 = vpop.eup %787 }
 0x270   : > { %v457_v14 = vadd.f32 1.0, %v788_v13 }
 0x272   : > { %789 = vrcp.f32 %v457_v14 }
 0x27f   : > { %v790_v16 = vpop.eup %789 }
 0x280   : > { %v463_v17 = vrot.slane %v790_v16, %v462_v15  ;;  %v482_v19 = vrot.slane %v790_v16, %v481_v18 }
 0x282   : > { %469 = vbcast.lane.b32.xlu1 %v463_v17, 264  ;;  %465 = vbcast.lane.b32.xlu0 %v463_v17, 256 }
 0x286   : > { %473 = vbcast.lane.b32.xlu1 %v463_v17, 272  ;;  %484 = vbcast.lane.b32.xlu0 %v482_v19, 256 }
 0x28a   : > { %477 = vbcast.lane.b32.xlu1 %v463_v17, 280  ;;  %492 = vbcast.lane.b32.xlu0 %v482_v19, 272 }
 0x28e   : > { %488 = vbcast.lane.b32.xlu1 %v482_v19, 264 }
 0x292   : > { %496 = vbcast.lane.b32.xlu1 %v482_v19, 280 }
 0x2f4   : > { %v470_v20 = vpop.permute.xlu1 %469  ;;  %v466_v21 = vpop.permute.xlu0 %465 }
 0x2f5   : > { %500 = vst.msk [vmem:[#allocation2 + $0x8] sm:$0xff] %vm498_vm8, %v470_v20  ;;  %499 = vst.msk [vmem:[#allocation2] sm:$0xff] %vm498_vm8, %v466_v21 }
 0x2f8   : > { %v474_v22 = vpop.permute.xlu1 %473  ;;  %v485_v23 = vpop.permute.xlu0 %484 }
 0x2f9   : > { %501 = vst.msk [vmem:[#allocation2 + $0x10] sm:$0xff] %vm498_vm8, %v474_v22  ;;  %503 = vst.msk [vmem:[#allocation2 + $0x20] sm:$0xff] %vm498_vm8, %v485_v23 }
 0x2fc   : > { %v478_v24 = vpop.permute.xlu1 %477  ;;  %v493_v25 = vpop.permute.xlu0 %492 }
 0x2fd   : > { %502 = vst.msk [vmem:[#allocation2 + $0x18] sm:$0xff] %vm498_vm8, %v478_v24  ;;  %505 = vst.msk [vmem:[#allocation2 + $0x30] sm:$0xff] %vm498_vm8, %v493_v25 }
 0x300   : > { %v489_v26 = vpop.permute.xlu1 %488 }
 0x301   : > { %504 = vst.msk [vmem:[#allocation2 + $0x28] sm:$0xff] %vm498_vm8, %v489_v26 }
 0x304   : > { %v497_v27 = vpop.permute.xlu1 %496 }
 0x305   : > { %506 = vst.msk [vmem:[#allocation2 + $0x38] sm:$0xff] %vm498_vm8, %v497_v27 }
 0x306 PF: > { %v525_v28 = vld [vmem:[#allocation2 + $0x10] sm:$0xff]  ;;  %v523_v29 = vld [vmem:[#allocation2] sm:$0xff]  ;;  %v892_v30 = vmov 0   ;;  %v526_v31 = vld [vmem:[#allocation2 + $0x18] sm:$0xff]  ;;  %s710_s28 = sshll.u32 %s937_s16, 11  ;;  %s617_s29 = sshll.u32 %s1023_s4, 4  ;;  %s1100_s29 = int_to_ptr.vmem [resolvable:$true] %s617_s29 }
 0x307   : > { %792 = vset.pattern.permute.xlu1 %v892_v30  ;;  %791 = vset.pattern.permute.xlu0 %v892_v30  ;;  %v524_v32 = vld [vmem:[#allocation2 + $0x8] sm:$0xff]  ;;  %v527_v34 = vld [vmem:[#allocation2 + $0x20] sm:$0xff]  ;;  %v529_v36 = vld [vmem:[#allocation2 + $0x30] sm:$0xff]  ;;  %s1098_s16 = scalar_lea.hbm %s1150_s3, %s710_s28  ;;  %s604_s10 = scalar_lea.sflag [#allocation5], %s1013_s5 }
 0x308   : > { %543 = vperm.xlu1 %792, %v525_v28   ;;  %533 = vperm.xlu0 %791, %v523_v29   ;;  %v528_v33 = vld [vmem:[#allocation2 + $0x28] sm:$0xff]  ;;  %v511_v37 = vld [vmem:[%s1017_s11 + $0x20] sm:$0xff]  ;;  %v513_v47 = vld [vmem:[%s1017_s11 + $0x30] sm:$0xff]  ;;  %p1159_p13 = scmp.ne.s32.totalorder %s1155_s24, 0  ;;  %s893_s23 = smov [#allocation6]  }
 0x309   : > { %v512_v38 = vld [vmem:[%s1017_s11 + $0x28] sm:$0xff]  ;;  %v507_v39 = vld [vmem:[%s1017_s11] sm:$0xff]  ;;  %v514_v48 = vld [vmem:[%s1017_s11 + $0x38] sm:$0xff]  ;;  %s825_s6 = sshll.u32 %s893_s23, 4  ;;  %s826_s6 = int_to_ptr.vmem [resolvable:$false] %s825_s6 }
 0x30a   : > { %v508_v40 = vld [vmem:[%s1017_s11 + $0x8] sm:$0xff]  ;;  %v509_v49 = vld [vmem:[%s1017_s11 + $0x10] sm:$0xff]  ;;  %v510_v50 = vld [vmem:[%s1017_s11 + $0x18] sm:$0xff]  ;;  %s827_s7 = scalar_lea.vmem %s826_s6, 4096  ;;  %p828_p7 = scmp.lt.s32.totalorder %s1100_s29, %s826_s6 }
 0x30b   : > { %v517_v57 = vld [vmem:[%s1017_s11 + $0x50] sm:$0xff]  ;;  %v518_v58 = vld [vmem:[%s1017_s11 + $0x58] sm:$0xff]  ;;  %v515_v59 = vld [vmem:[%s1017_s11 + $0x40] sm:$0xff] }
 0x30c   : > { %548 = vperm.xlu1 %792, %v526_v31   ;;  %538 = vperm.xlu0 %791, %v524_v32   ;;  %v530_v35 = vld [vmem:[#allocation2 + $0x38] sm:$0xff]  ;;  %v516_v60 = vld [vmem:[%s1017_s11 + $0x48] sm:$0xff]  ;;  %v521_v3 = vld [vmem:[%s1017_s11 + $0x70] sm:$0xff] }
 0x30d   : > { %v522_v4 = vld [vmem:[%s1017_s11 + $0x78] sm:$0xff]  ;;  %v519_v5 = vld [vmem:[%s1017_s11 + $0x60] sm:$0xff]  ;;  %v520_v6 = vld [vmem:[%s1017_s11 + $0x68] sm:$0xff]  ;;  %s821_s11 = scalar_lea.vmem %s1100_s29, 2048 }
 0x30e   : > { %p822_p12 = scmp.ne.s32.totalorder %s1100_s29, %s821_s11  ;;  %p829_p8 = scmp.lt.s32.totalorder %s827_s7, %s821_s11 }
 0x310   : > { %558 = vperm.xlu1 %792, %v528_v33   ;;  %553 = vperm.xlu0 %791, %v527_v34   ;;  %p823_p4 = pnand %p822_p12, %p1159_p13  ;;  %p830_p10 = por %p829_p8, %p828_p7 }
 0x312   : > { %p824_p5 = pneg %p823_p4 }
 0x314   : > { %568 = vperm.xlu1 %792, %v530_v35   ;;  %563 = vperm.xlu0 %791, %v529_v36   ;;  %p831_p0 = pnand %p830_p10, %p824_p5 }
 0x383   : > { %v544_v41 = vpop.permute.xlu1 %543  ;;  %v534_v42 = vpop.permute.xlu0 %533 }
 0x384   : > { %v575_v43 = vmul.f32 %v544_v41, %v511_v37  ;;  %v576_v44 = vmul.f32 %v544_v41, %v512_v38  ;;  %v571_v45 = vmul.f32 %v534_v42, %v507_v39  ;;  %v572_v46 = vmul.f32 %v534_v42, %v508_v40 }
 0x386   : > { %591 = vst [vmem:[%s1023_s4 + $0x20] sm:$0xff] %v575_v43  ;;  %592 = vst [vmem:[%s1023_s4 + $0x28] sm:$0xff] %v576_v44 }
 0x387   : > { %587 = vst [vmem:[%s1023_s4] sm:$0xff] %v571_v45  ;;  %588 = vst [vmem:[%s1023_s4 + $0x8] sm:$0xff] %v572_v46  ;;  %v549_v51 = vpop.permute.xlu1 %548  ;;  %v539_v52 = vpop.permute.xlu0 %538 }
 0x388   : > { %v577_v53 = vmul.f32 %v549_v51, %v513_v47  ;;  %v578_v54 = vmul.f32 %v549_v51, %v514_v48  ;;  %v573_v55 = vmul.f32 %v539_v52, %v509_v49  ;;  %v574_v56 = vmul.f32 %v539_v52, %v510_v50 }
 0x38a   : > { %593 = vst [vmem:[%s1023_s4 + $0x30] sm:$0xff] %v577_v53  ;;  %594 = vst [vmem:[%s1023_s4 + $0x38] sm:$0xff] %v578_v54 }
 0x38b   : > { %589 = vst [vmem:[%s1023_s4 + $0x10] sm:$0xff] %v573_v55  ;;  %590 = vst [vmem:[%s1023_s4 + $0x18] sm:$0xff] %v574_v56  ;;  %v559_v61 = vpop.permute.xlu1 %558  ;;  %v554_v62 = vpop.permute.xlu0 %553 }
 0x38c   : > { %v581_v63 = vmul.f32 %v559_v61, %v517_v57  ;;  %v582_v0 = vmul.f32 %v559_v61, %v518_v58  ;;  %v579_v1 = vmul.f32 %v554_v62, %v515_v59  ;;  %v580_v2 = vmul.f32 %v554_v62, %v516_v60 }
 0x38e   : > { %597 = vst [vmem:[%s1023_s4 + $0x50] sm:$0xff] %v581_v63  ;;  %598 = vst [vmem:[%s1023_s4 + $0x58] sm:$0xff] %v582_v0 }
 0x38f   : > { %595 = vst [vmem:[%s1023_s4 + $0x40] sm:$0xff] %v579_v1  ;;  %596 = vst [vmem:[%s1023_s4 + $0x48] sm:$0xff] %v580_v2  ;;  %v569_v7 = vpop.permute.xlu1 %568  ;;  %v564_v8 = vpop.permute.xlu0 %563 }
 0x390   : > { %v585_v9 = vmul.f32 %v569_v7, %v521_v3  ;;  %v586_v10 = vmul.f32 %v569_v7, %v522_v4  ;;  %v583_v11 = vmul.f32 %v564_v8, %v519_v5  ;;  %v584_v12 = vmul.f32 %v564_v8, %v520_v6 }
 0x392   : > { %601 = vst [vmem:[%s1023_s4 + $0x70] sm:$0xff] %v585_v9  ;;  %602 = vst [vmem:[%s1023_s4 + $0x78] sm:$0xff] %v586_v10 }
 0x393   : > { %599 = vst [vmem:[%s1023_s4 + $0x60] sm:$0xff] %v583_v11  ;;  %600 = vst [vmem:[%s1023_s4 + $0x68] sm:$0xff] %v584_v12 }
 0x394   : > { %834 = shalt.err (!%p831_p0)
}
 0x395   : > { %s835_s4 = scalar_lea.hbm %s1098_s16, 2048  ;;  %s839_s19 = scalar_lea.hbm %s1150_s3, 4096 }
 0x396   : > { %p836_p2 = scmp.ne.s32.totalorder %s1098_s16, %s835_s4  ;;  %p840_p3 = scmp.lt.s32.totalorder %s1098_s16, %s1150_s3 }
 0x397   : > { %p841_p6 = scmp.lt.s32.totalorder %s839_s19, %s835_s4 }
 0x398   : > { %p837_p9 = pnand %p836_p2, %p1159_p13 }
 0x399   : > { %p842_p11 = por %p841_p6, %p840_p3 }
 0x39a   : > { %p838_p1 = pneg %p837_p9 }
 0x39c   : > { %p843_p12 = pnand %p842_p11, %p838_p1 }
 0x39e   : > { %846 = shalt.err (!%p843_p12)
}
 0x39f   : > { %s894_s26 = smov 256   ;;  %s895_s27 = smov 16  }
 0x3a0   : > { %736 = dma.vmem_to_hbm [thread:$0]  (%p1159_p13), %s1100_s29, 2048, %s1098_s16, %s604_s10, %s894_s26, %s894_s26, %s895_s27  }
 0x3a1 PF: > { %s632_s28 = sand.u32 1, %s873_s12   ;;  %p1160_p4 = scmp.ne.s32.totalorder %s1156_s25, 0 }
 0x3a2   : > { %p1161_p5 = scmp.ge.s32.totalorder %s885_s15, 2  ;;  %s633_s30 = scalar_lea.sflag [#allocation5], %s632_s28 }
 0x3a4   : > { %p743_p7 = pnand %p1161_p5, %p1160_p4 }
 0x3a6   : > { %p744_p8 = pneg %p743_p7 }
 0x3a8   : > { %868 = dma.done.wait (%p744_p8), %s633_s30, 2048  }
 0x3a9   : > { %870 = vsyncadd (%p744_p8), %s633_s30, 4294965248  ;;  %p16_p10 = scmp.ge.s32.totalorder %s941_s18, 4   ;;  %s1162_s12 = smov %s877_s13 }
 0x3aa   : > { %s1163_s13 = smov %s881_s14  ;;  %s1164_s14 = smov %s953_s21 }
 0x3ab   : > { %s1165_s15 = smov %s941_s18  ;;  %18 = sbr.rel (!%p16_p10) target bundleno = 5 (0x5), region = 81 }
 0x3b0   :  { %638 = vsyncpa [#allocation4], 1 }
 0x3b1   :  { %640 = vsyncpa [#allocation4 + $0x1], 1 }
 0x3b2   :  { %641 = vsyncpa [#allocation5], 1 }
 0x3b3   :  { %643 = vsyncpa [#allocation5 + $0x1], 1 }

</bundles_post_ra>
